<compile_context>
chip_gen: v7x
topology: tpu7x:2x2x1
jax: 0.10.0
libtpu: 0.0.40
codegen_flags: <defaults>
</compile_context>

<pallas_src>
import jax
import jax.numpy as jnp
from jax.experimental import pallas as pl
from jax.experimental.pallas import tpu as pltpu

_LANE_WIDTH = 512          # multiple of 128 -> lane-dense, unmasked vld/vst
_SUBLANES = 8
_TARGET_BLOCK_BYTES = 2 << 20   # ~2 MiB per block (1-4 MiB sweet spot)


def _affine_kernel(x_ref, o_ref):
    # Hot path: elementwise multiply-add on the VPU.  Python int literals are
    # weakly typed, so float inputs stay float and int inputs stay int.
    o_ref[...] = x_ref[...] * 2 + 3


def pt_module_forward(x: jax.Array) -> jax.Array:
    """y[...] = x[...] * 2 + 3, matching PtModule.forward."""
    orig_shape = x.shape
    dtype = x.dtype
    n = x.size

    # ---- reshape to a lane-dense (rows, 512) slab --------------------------
    rows = pl.cdiv(n, _LANE_WIDTH)
    padded_elems = rows * _LANE_WIDTH
    x_flat = x.reshape(-1)
    if padded_elems != n:
        x_flat = jnp.pad(x_flat, (0, padded_elems - n))
    x2d = x_flat.reshape(rows, _LANE_WIDTH)

    # ---- pick a block size from a VMEM byte budget -------------------------
    row_bytes = _LANE_WIDTH * dtype.itemsize
    block_rows = (_TARGET_BLOCK_BYTES // row_bytes) // _SUBLANES * _SUBLANES
    block_rows = max(_SUBLANES, block_rows)

    if rows <= block_rows:
        # Small tensor: single invocation, full-array block (no grid-step
        # overhead; full-extent block sidesteps the (8,128) divisibility rule).
        y2d = pl.pallas_call(
            _affine_kernel,
            out_shape=jax.ShapeDtypeStruct(x2d.shape, dtype),
            in_specs=[pl.BlockSpec(x2d.shape, lambda: (0, 0))],
            out_specs=pl.BlockSpec(x2d.shape, lambda: (0, 0)),
        )(x2d)
    else:
        # Large tensor: pad rows so every block is full, then 1-D grid over
        # row-blocks.  ~2 MiB blocks keep 2 arrays x 2 buffers well under the
        # 32 MiB default scoped VMEM limit on every chip generation.
        grid_rows = pl.cdiv(rows, block_rows) * block_rows
        if grid_rows != rows:
            x2d = jnp.pad(x2d, ((0, grid_rows - rows), (0, 0)))
        num_blocks = grid_rows // block_rows
        y2d = pl.pallas_call(
            _affine_kernel,
            out_shape=jax.ShapeDtypeStruct((grid_rows, _LANE_WIDTH), dtype),
            grid=(num_blocks,),
            in_specs=[pl.BlockSpec((block_rows, _LANE_WIDTH), lambda i: (i, 0))],
            out_specs=pl.BlockSpec((block_rows, _LANE_WIDTH), lambda i: (i, 0)),
            compiler_params=pltpu.CompilerParams(
                dimension_semantics=("parallel",),  # shards blocks across v7x's 2 TCs
            ),
            # NOTE: if the caller donates x (doesn't need it afterwards),
            # adding input_output_aliases={0: 0} halves HBM footprint.
        )(x2d)

    # ---- undo padding / reshape back ---------------------------------------
    return y2d.reshape(-1)[:n].reshape(orig_shape)


if __name__ == "__main__":
    key = jax.random.PRNGKey(0)
    x = jax.random.normal(key, (2, 4, 16, 16), dtype=jnp.float32)

    y = pt_module_forward(x)
    y = jax.block_until_ready(y)

    # Reference check against the exact PyTorch semantics (x * 2 + 3).
    y_ref = x * 2.0 + 3.0
    assert y.shape == x.shape and y.dtype == x.dtype
    assert jnp.allclose(y, y_ref, atol=1e-6, rtol=1e-6)

    print("KERNEL_OK")
</pallas_src>

<mosaic_0001>
module attributes {stable_mosaic.version = 11 : i64} {
  func.func @_affine_kernel(%arg0: memref<4x512xf32, #tpu.memory_space<vmem>>, %arg1: memref<4x512xf32, #tpu.memory_space<vmem>>) attributes {dimension_semantics = [], scalar_prefetch = 0 : i64, scratch_operands = 0 : i64, tpu.core_type = #tpu.core_type<tc>} {
    %c0 = arith.constant 0 : index
    %c0_0 = arith.constant 0 : index
    %0 = vector.load %arg0[%c0, %c0_0] : memref<4x512xf32, #tpu.memory_space<vmem>>, vector<4x512xf32>
    %cst = arith.constant 2.000000e+00 : f32
    %1 = vector.broadcast %cst : f32 to vector<4x512xf32>
    %2 = arith.mulf %0, %1 : vector<4x512xf32>
    %cst_1 = arith.constant 3.000000e+00 : f32
    %3 = vector.broadcast %cst_1 : f32 to vector<4x512xf32>
    %4 = arith.addf %2, %3 : vector<4x512xf32>
    %c0_2 = arith.constant 0 : index
    %c0_3 = arith.constant 0 : index
    %5 = vector.load %arg1[%c0_2, %c0_3] : memref<4x512xf32, #tpu.memory_space<vmem>>, vector<4x512xf32>
    tpu.vector_store %arg1[%c0_2, %c0_3], %4 {strides = array<i32>} : memref<4x512xf32, #tpu.memory_space<vmem>>, vector<4x512xf32>,
    return
  }
}

</mosaic_0001>

<bundles_post_ra>
// kernel: tpu_custom_call.1
= control target key start
LH: loop header
LB: loop body
LE: loop exit
PB: predicated region body
PF: predicated region fallthrough
CT: control target
= control target key end

     0   :  { %6 = vsyncpa [#allocation3], 0  ;;  %s130_s0 = inlined_call_operand.hbm [shape: f32[4,512], index: 0, kind: input, shape index: {}]   ;;  %s131_s1 = inlined_call_operand.hbm [shape: f32[4,512], index: 1, kind: output, shape index: {}]  }
   0x1   :  { %7 = vsyncpa [#allocation4], 0  ;;  %s94_s6 = smov [#allocation2]   ;;  %s46_s10 = scalar_lea.hbm %s130_s0, 256 }
   0x2   :  { %s14_s7 = sshll.u32 %s94_s6, 4  ;;  %p47_p0 = scmp.ne.s32.totalorder %s130_s0, %s46_s10  ;;  %s15_s7 = int_to_ptr.vmem [resolvable:$true] %s14_s7 }
   0x3   :  { %p50_p1 = scmp.lt.u32.totalorder %s46_s10, %s130_s0 }
   0x5   :  { %p52_p2 = pnand %p50_p1, %p47_p0 }
   0x7   :  { %55 = shalt.err (!%p52_p2)
}
   0x8   :  { %s56_s15 = scalar_lea.vmem %s15_s7, 256  ;;  %p61_p4 = scmp.lt.s32.totalorder %s15_s7, %s15_s7 }
   0x9   :  { %p57_p3 = scmp.ne.s32.totalorder %s15_s7, %s56_s15  ;;  %p62_p5 = scmp.lt.s32.totalorder %s56_s15, %s56_s15 }
   0xb   :  { %p63_p6 = por %p62_p5, %p61_p4 }
   0xd   :  { %p64_p7 = pnand %p63_p6, %p57_p3 }
   0xf   :  { %67 = shalt.err (!%p64_p7)
}
  0x10   :  { %17 = dma.hbm_to_vmem [thread:$0]  %s130_s0, 256, %s15_s7, [#allocation3]  }
  0x11   :  { %90 = dma.done.wait [#allocation3], 256  }
  0x12   :  { %91 = vsyncadd [#allocation3], 4294967040  ;;  %v21_v0 = vld [vmem:[#allocation2] sm:$0xff]  ;;  %v22_v1 = vld [vmem:[#allocation2 + $0x8] sm:$0xff]  ;;  %s95_s18 = smov [#allocation5]  }
  0x13   :  { %s35_s19 = sshll.u32 %s95_s18, 4  ;;  %v23_v2 = vmul.f32 2.0, %v21_v0  ;;  %v24_v3 = vmul.f32 2.0, %v22_v1  ;;  %s36_s19 = int_to_ptr.vmem [resolvable:$true] %s35_s19 }
  0x14   :  { %s68_s20 = scalar_lea.vmem %s36_s19, 256  ;;  %p73_p9 = scmp.lt.s32.totalorder %s36_s19, %s36_s19 }
  0x15   :  { %v25_v4 = vadd.f32 3.0, %v23_v2  ;;  %v26_v5 = vadd.f32 3.0, %v24_v3  ;;  %p69_p8 = scmp.ne.s32.totalorder %s36_s19, %s68_s20  ;;  %p74_p10 = scmp.lt.s32.totalorder %s68_s20, %s68_s20 }
  0x17   :  { %27 = vst [vmem:[#allocation5] sm:$0xff] %v25_v4  ;;  %28 = vst [vmem:[#allocation5 + $0x8] sm:$0xff] %v26_v5  ;;  %p75_p11 = por %p74_p10, %p73_p9 }
  0x19   :  { %p76_p12 = pnand %p75_p11, %p69_p8 }
  0x1b   :  { %79 = shalt.err (!%p76_p12)
}
  0x1c   :  { %s80_s22 = scalar_lea.hbm %s131_s1, 256 }
  0x1d   :  { %p81_p13 = scmp.ne.s32.totalorder %s131_s1, %s80_s22  ;;  %p84_p0 = scmp.lt.u32.totalorder %s80_s22, %s131_s1 }
  0x1f   :  { %p86_p1 = pnand %p84_p0, %p81_p13 }
  0x21   :  { %89 = shalt.err (!%p86_p1)
}
  0x22   :  { %38 = dma.vmem_to_hbm [thread:$0]  %s36_s19, 256, %s131_s1, [#allocation4]  }
  0x23   :  { %92 = dma.done.wait [#allocation4], 256  }
  0x24   :  { %93 = vsyncadd [#allocation4], 4294967040 }
  0x25   :  { %42 = vsyncpa [#allocation3], 1 }
  0x26   :  { %43 = vsyncpa [#allocation4], 1 }

</bundles_post_ra>
